<compile_context>
chip_gen: v6e
topology: v6e:2x2x1
jax: 0.10.0
libtpu: 0.0.40
codegen_flags: <defaults>
</compile_context>

<pallas_src>
import functools
import math

import jax
import jax.numpy as jnp
import numpy as np
from jax.experimental import pallas as pl
from jax.experimental.pallas import tpu as pltpu


def _bert_attention_kernel(
    hs_ref,      # (1, S, H)  f32  full-sequence hidden states (Q/K/V source + residual)
    mask_ref,    # (1, 1, S)  f32  attention mask (1 keep / 0 mask)
    wq_ref,      # (H, H)     bf16 query weight [in,out], 1/sqrt(dh) pre-folded
    bq_ref,      # (1, H)     f32  query bias, 1/sqrt(dh) pre-folded
    wkv_ref,     # (H, 2H)    bf16 fused [Wk | Wv], [in,out]
    bkv_ref,     # (1, 2H)    f32
    wo_ref,      # (H, H)     bf16 output dense, [in,out]
    bo_ref,      # (1, H)     f32
    gamma_ref,   # (1, H)     f32  LayerNorm weight
    beta_ref,    # (1, H)     f32  LayerNorm bias
    out_ref,     # (1, TQ, H) f32
    kv_ref,      # VMEM scratch (S, 2H) bf16 -- K/V cache for the current batch element
    ctx_ref,     # VMEM scratch (TQ, H) f32  -- per-head context columns
    *,
    num_heads: int,
    head_dim: int,
    tq: int,
    ln_eps: float,
):
    H = num_heads * head_dim
    qi = pl.program_id(1)

    # --- K/V projection: computed once per batch element (first query tile) and cached in
    #     VMEM scratch; reused by every subsequent query tile (qi axis is "arbitrary").
    @pl.when(qi == 0)
    def _():
        hs_all = hs_ref[0].astype(jnp.bfloat16)                                 # (S, H)
        kv = jnp.dot(hs_all, wkv_ref[...],
                     preferred_element_type=jnp.float32) + bkv_ref[...]         # (S, 2H) f32
        kv_ref[...] = kv.astype(kv_ref.dtype)                                   # bf16 cache

    # --- Q projection for this query tile only (scale folded into wq/bq in the wrapper).
    q_start = pl.multiple_of(qi * tq, tq)
    hs_q = hs_ref[0, pl.ds(q_start, tq), :]                                     # (TQ, H) f32
    q = jnp.dot(hs_q.astype(jnp.bfloat16), wq_ref[...],
                preferred_element_type=jnp.float32) + bq_ref[...]               # (TQ, H) f32

    # HF extended mask: (1 - m) * -10000, broadcast over query rows.
    ext_mask = (1.0 - mask_ref[0]) * (-10000.0)                                 # (1, S)

    # --- per-head scaled-dot-product attention; context columns written straight into the
    #     VMEM scratch (no concatenate).  Softmax normalization deferred to the (TQ,dh) ctx.
    for h in range(num_heads):
        lo = h * head_dim
        hi = lo + head_dim
        qh = q[:, lo:hi].astype(jnp.bfloat16)                                   # (TQ, dh)
        kh = kv_ref[:, lo:hi]                                                   # (S, dh) bf16
        vh = kv_ref[:, H + lo:H + hi]                                           # (S, dh) bf16

        # q @ k^T without materializing an explicit transpose of k.
        scores = jax.lax.dot_general(
            qh, kh, dimension_numbers=(((1,), (1,)), ((), ())),
            preferred_element_type=jnp.float32)                                 # (TQ, S) f32
        scores = scores + ext_mask
        scores = scores - jnp.max(scores, axis=-1, keepdims=True)
        p = jnp.exp(scores)
        inv_denom = pl.reciprocal(jnp.sum(p, axis=-1, keepdims=True), approx=True)  # (TQ, 1)
        ctx_ref[:, lo:hi] = jnp.dot(
            p.astype(jnp.bfloat16), vh,
            preferred_element_type=jnp.float32) * inv_denom                     # (TQ, dh)

    # --- BertSelfOutput: dense -> residual add -> LayerNorm (two-pass, f32).
    ctx = ctx_ref[...].astype(jnp.bfloat16)                                     # (TQ, H)
    attn_out = jnp.dot(ctx, wo_ref[...],
                       preferred_element_type=jnp.float32) + bo_ref[...]        # (TQ, H)
    x = attn_out + hs_q
    mean = jnp.mean(x, axis=-1, keepdims=True)
    xc = x - mean
    var = jnp.mean(xc * xc, axis=-1, keepdims=True)
    y = xc * jax.lax.rsqrt(var + ln_eps)
    y = y * gamma_ref[...] + beta_ref[...]

    out_ref[0] = y.astype(out_ref.dtype)


def _pick_tq(S: int) -> int:
    """Query-tile rows.  Full sequence up to 512 (single tile, K/V projected exactly once);
    otherwise the largest divisor of S <= 256 (use 128 on v7x if >=2 parallel steps per core
    are needed).  Never silently falls back to a huge untiled block for non-divisible S."""
    if S <= 512:
        return S
    for cand in (256, 128, 64, 32, 16, 8):
        if S % cand == 0:
            return cand
    return S


def _vmem_limit_bytes(S: int, H: int, tq: int) -> int:
    f32, bf16 = 4, 2
    est = (
        2 * S * H * f32                       # hs block (double-buffered)
        + 2 * S * f32                         # mask block (double-buffered)
        + H * H * bf16 + H * f32              # wq + bq        (single-buffered)
        + H * 2 * H * bf16 + 2 * H * f32      # wkv + bkv      (single-buffered)
        + H * H * bf16 + 3 * H * f32          # wo + bo + gamma + beta
        + 2 * tq * H * f32                    # output block (double-buffered)
        + S * 2 * H * bf16                    # kv scratch
        + tq * H * f32                        # ctx scratch
        + 4 * tq * S * f32                    # live score/prob temporaries + headroom
    )
    # Clamp to 64 MiB so the limit is legal on v7x as well as v5e/v6e.
    return int(min(max(2 * est, 32 * 1024 * 1024), 64 * 1024 * 1024))


def bert_attention(hidden_states, attention_mask, params, *,
                   num_heads: int, head_dim: int, ln_eps: float = 1e-12, tq=None):
    """hidden_states: [B, S, H] f32; attention_mask: [B, S] f32 (1 keep / 0 mask)."""
    B, S, H = hidden_states.shape
    assert H == num_heads * head_dim

    if tq is None:
        tq = _pick_tq(S)
    assert S % tq == 0
    num_q_tiles = S // tq

    hidden_states = hidden_states.astype(jnp.float32)
    mask3 = attention_mask.reshape(B, 1, S).astype(jnp.float32)

    # PyTorch Linear stores [out, in]; pre-transpose to [in, out].  Fold 1/sqrt(dh) into the
    # query weight/bias (in f32, before the bf16 cast).  K/V weights fused into one [H, 2H]
    # matrix so the cached K/V projection is a single wide-N MXU pass.
    scale = 1.0 / math.sqrt(head_dim)
    wq = (params["wq"].T * scale).astype(jnp.bfloat16)                          # (H, H)
    bq = (params["bq"] * scale).reshape(1, H).astype(jnp.float32)
    wkv = jnp.concatenate([params["wk"].T, params["wv"].T], axis=1).astype(jnp.bfloat16)  # (H, 2H)
    bkv = jnp.concatenate([params["bk"], params["bv"]]).reshape(1, 2 * H).astype(jnp.float32)
    wo = params["wo"].T.astype(jnp.bfloat16)                                    # (H, H)
    bo = params["bo"].reshape(1, H).astype(jnp.float32)
    gamma = params["ln_gamma"].reshape(1, H).astype(jnp.float32)
    beta = params["ln_beta"].reshape(1, H).astype(jnp.float32)

    kernel = functools.partial(
        _bert_attention_kernel,
        num_heads=num_heads, head_dim=head_dim, tq=tq, ln_eps=ln_eps)

    def const_spec(shape):
        # Constant blocks (index never changes): single-buffer them to save VMEM.
        return pl.BlockSpec(shape, lambda b, qi: (0, 0),
                            pipeline_mode=pl.Buffered(buffer_count=1))

    return pl.pallas_call(
        kernel,
        out_shape=jax.ShapeDtypeStruct((B, S, H), jnp.float32),
        grid_spec=pltpu.PrefetchScalarGridSpec(
            num_scalar_prefetch=0,
            grid=(B, num_q_tiles),           # qi innermost: K/V cache reused across q tiles
            in_specs=[
                pl.BlockSpec((1, S, H), lambda b, qi: (b, 0, 0)),   # hidden states (full seq)
                pl.BlockSpec((1, 1, S), lambda b, qi: (b, 0, 0)),   # attention mask
                const_spec((H, H)),                                 # wq (scaled)
                const_spec((1, H)),                                 # bq (scaled)
                const_spec((H, 2 * H)),                             # wkv
                const_spec((1, 2 * H)),                             # bkv
                const_spec((H, H)),                                 # wo
                const_spec((1, H)),                                 # bo
                const_spec((1, H)),                                 # gamma
                const_spec((1, H)),                                 # beta
            ],
            out_specs=pl.BlockSpec((1, tq, H), lambda b, qi: (b, qi, 0)),
            scratch_shapes=[
                pltpu.VMEM((S, 2 * H), jnp.bfloat16),   # K/V cache (persists across qi)
                pltpu.VMEM((tq, H), jnp.float32),       # per-head context columns
            ],
        ),
        compiler_params=pltpu.CompilerParams(
            # B parallel (megacore sharding); qi must stay sequential on one core because the
            # K/V scratch computed at qi==0 is reused by later q tiles of the same batch elem.
            dimension_semantics=("parallel", "arbitrary"),
            vmem_limit_bytes=_vmem_limit_bytes(S, H, tq)),
    )(hidden_states, mask3, wq, bq, wkv, bkv, wo, bo, gamma, beta)


def _reference(hidden_states, attention_mask, params, *, num_heads, head_dim, ln_eps=1e-12):
    """Pure-JAX f32 reference mirroring the PyTorch forward (eval mode, absolute pos emb)."""
    B, S, H = hidden_states.shape
    q = hidden_states @ params["wq"].T + params["bq"]
    k = hidden_states @ params["wk"].T + params["bk"]
    v = hidden_states @ params["wv"].T + params["bv"]

    def split(x):  # (B,S,H) -> (B,nh,S,dh)
        return x.reshape(B, S, num_heads, head_dim).transpose(0, 2, 1, 3)

    q, k, v = split(q), split(k), split(v)
    scores = jnp.einsum("bhqd,bhkd->bhqk", q, k) / math.sqrt(head_dim)
    ext = (1.0 - attention_mask)[:, None, None, :] * -10000.0
    scores = scores + ext
    probs = jax.nn.softmax(scores, axis=-1)
    ctx = jnp.einsum("bhqk,bhkd->bhqd", probs, v)
    ctx = ctx.transpose(0, 2, 1, 3).reshape(B, S, H)
    out = ctx @ params["wo"].T + params["bo"]
    x = out + hidden_states
    mean = x.mean(-1, keepdims=True)
    var = ((x - mean) ** 2).mean(-1, keepdims=True)
    return (x - mean) / jnp.sqrt(var + ln_eps) * params["ln_gamma"] + params["ln_beta"]


if __name__ == "__main__":
    # config: hidden_size=32, num_attention_heads=4 -> head_dim=8; batch=2, seq=8
    B, S, H, NH = 2, 8, 32, 4
    DH = H // NH

    key = jax.random.PRNGKey(0)
    ks = jax.random.split(key, 12)
    init = lambda k, shape, scale=0.05: (scale * jax.random.normal(k, shape)).astype(jnp.float32)

    params = {
        "wq": init(ks[0], (H, H)), "bq": init(ks[1], (H,)),
        "wk": init(ks[2], (H, H)), "bk": init(ks[3], (H,)),
        "wv": init(ks[4], (H, H)), "bv": init(ks[5], (H,)),
        "wo": init(ks[6], (H, H)), "bo": init(ks[7], (H,)),
        "ln_gamma": jnp.ones((H,), jnp.float32),
        "ln_beta": jnp.zeros((H,), jnp.float32),
    }

    hidden_states = jax.random.normal(ks[8], (B, S, H), dtype=jnp.float32)
    # attention mask: keep all but the last 2 positions of batch element 1
    attention_mask = jnp.ones((B, S), jnp.float32).at[1, -2:].set(0.0)

    out = bert_attention(hidden_states, attention_mask, params,
                         num_heads=NH, head_dim=DH)
    out = jax.block_until_ready(out)

    ref = _reference(hidden_states, attention_mask, params, num_heads=NH, head_dim=DH)
    # bf16 MXU operands + approx reciprocal -> relaxed tolerance vs the f32 reference.
    np.testing.assert_allclose(np.asarray(out), np.asarray(ref), rtol=2e-2, atol=2e-2)

    print("KERNEL_OK")
</pallas_src>

<mosaic_0001>
module attributes {stable_mosaic.version = 11 : i64} {
  func.func @_bert_attention_kernel(%arg0: i32, %arg1: i32, %arg2: memref<1x8x32xf32, #tpu.memory_space<vmem>>, %arg3: memref<1x1x8xf32, #tpu.memory_space<vmem>>, %arg4: memref<32x32xbf16, #tpu.memory_space<vmem>>, %arg5: memref<1x32xf32, #tpu.memory_space<vmem>>, %arg6: memref<32x64xbf16, #tpu.memory_space<vmem>>, %arg7: memref<1x64xf32, #tpu.memory_space<vmem>>, %arg8: memref<32x32xbf16, #tpu.memory_space<vmem>>, %arg9: memref<1x32xf32, #tpu.memory_space<vmem>>, %arg10: memref<1x32xf32, #tpu.memory_space<vmem>>, %arg11: memref<1x32xf32, #tpu.memory_space<vmem>>, %arg12: memref<1x8x32xf32, #tpu.memory_space<vmem>>, %arg13: memref<8x64xbf16, #tpu.memory_space<vmem>>, %arg14: memref<8x32xf32, #tpu.memory_space<vmem>>) attributes {dimension_semantics = [#tpu.dimension_semantics<parallel>, #tpu.dimension_semantics<arbitrary>], iteration_bounds = array<i64: 2, 1>, scalar_prefetch = 0 : i64, scratch_operands = 2 : i64, tpu.core_type = #tpu.core_type<tc>, window_params = [{transform_indices = @transform_0, window_bounds = array<i64: 1, 8, 32>}, {transform_indices = @transform_1, window_bounds = array<i64: 1, 1, 8>}, {pipeline_mode = #tpu.pipeline_mode<synchronous>, transform_indices = @transform_2, window_bounds = array<i64: 32, 32>}, {pipeline_mode = #tpu.pipeline_mode<synchronous>, transform_indices = @transform_3, window_bounds = array<i64: 1, 32>}, {pipeline_mode = #tpu.pipeline_mode<synchronous>, transform_indices = @transform_4, window_bounds = array<i64: 32, 64>}, {pipeline_mode = #tpu.pipeline_mode<synchronous>, transform_indices = @transform_5, window_bounds = array<i64: 1, 64>}, {pipeline_mode = #tpu.pipeline_mode<synchronous>, transform_indices = @transform_6, window_bounds = array<i64: 32, 32>}, {pipeline_mode = #tpu.pipeline_mode<synchronous>, transform_indices = @transform_7, window_bounds = array<i64: 1, 32>}, {pipeline_mode = #tpu.pipeline_mode<synchronous>, transform_indices = @transform_8, window_bounds = array<i64: 1, 32>}, {pipeline_mode = #tpu.pipeline_mode<synchronous>, transform_indices = @transform_9, window_bounds = array<i64: 1, 32>}, {transform_indices = @transform_10, window_bounds = array<i64: 1, 8, 32>}]} {
    %c0_i32 = arith.constant 0 : i32
    %0 = arith.cmpi eq, %arg1, %c0_i32 : i32
    %1 = arith.extui %0 : i1 to i32
    %c0_i32_0 = arith.constant 0 : i32
    %2 = arith.cmpi ne, %1, %c0_i32_0 : i32
    scf.if %2 {
      %c0_63 = arith.constant 0 : index
      %c0_64 = arith.constant 0 : index
      %c0_65 = arith.constant 0 : index
      %133 = vector.load %arg2[%c0_63, %c0_64, %c0_65] : memref<1x8x32xf32, #tpu.memory_space<vmem>>, vector<1x8x32xf32>
      %134 = vector.shape_cast %133 : vector<1x8x32xf32> to vector<8x32xf32>
      %135 = arith.truncf %134 : vector<8x32xf32> to vector<8x32xbf16>
      %c0_66 = arith.constant 0 : index
      %c0_67 = arith.constant 0 : index
      %136 = vector.load %arg6[%c0_66, %c0_67] : memref<32x64xbf16, #tpu.memory_space<vmem>>, vector<32x64xbf16>
      %cst_68 = arith.constant dense<0.000000e+00> : vector<8x64xf32>
      %137 = tpu.matmul %135, %136, %cst_68 {dimension_numbers = #tpu.dot_dimension_numbers<[1], [0], [0], [1], [0, 0, 1, 1], [], []>} : vector<8x32xbf16>, vector<32x64xbf16>, vector<8x64xf32> -> vector<8x64xf32>
      %c0_69 = arith.constant 0 : index
      %c0_70 = arith.constant 0 : index
      %138 = vector.load %arg7[%c0_69, %c0_70] : memref<1x64xf32, #tpu.memory_space<vmem>>, vector<1x64xf32>
      %139 = vector.broadcast %138 : vector<1x64xf32> to vector<8x64xf32>
      %140 = arith.addf %137, %139 : vector<8x64xf32>
      %141 = arith.truncf %140 : vector<8x64xf32> to vector<8x64xbf16>
      %c0_71 = arith.constant 0 : index
      %c0_72 = arith.constant 0 : index
      %142 = vector.load %arg13[%c0_71, %c0_72] : memref<8x64xbf16, #tpu.memory_space<vmem>>, vector<8x64xbf16>
      tpu.vector_store %arg13[%c0_71, %c0_72], %141 {strides = array<i32>} : memref<8x64xbf16, #tpu.memory_space<vmem>>, vector<8x64xbf16>,
    } else {
    }
    %c8_i32 = arith.constant 8 : i32
    %3 = arith.muli %arg1, %c8_i32 : i32
    %4 = tpu.assume_multiple %3, 8 : i32
    %c0 = arith.constant 0 : index
    %5 = arith.index_cast %4 : i32 to index
    %c0_1 = arith.constant 0 : index
    %6 = vector.load %arg2[%c0, %5, %c0_1] : memref<1x8x32xf32, #tpu.memory_space<vmem>>, vector<1x8x32xf32>
    %7 = vector.shape_cast %6 : vector<1x8x32xf32> to vector<8x32xf32>
    %8 = arith.truncf %7 : vector<8x32xf32> to vector<8x32xbf16>
    %c0_2 = arith.constant 0 : index
    %c0_3 = arith.constant 0 : index
    %9 = vector.load %arg4[%c0_2, %c0_3] : memref<32x32xbf16, #tpu.memory_space<vmem>>, vector<32x32xbf16>
    %cst = arith.constant dense<0.000000e+00> : vector<8x32xf32>
    %10 = tpu.matmul %8, %9, %cst {dimension_numbers = #tpu.dot_dimension_numbers<[1], [0], [0], [1], [0, 0, 1, 1], [], []>} : vector<8x32xbf16>, vector<32x32xbf16>, vector<8x32xf32> -> vector<8x32xf32>
    %c0_4 = arith.constant 0 : index
    %c0_5 = arith.constant 0 : index
    %11 = vector.load %arg5[%c0_4, %c0_5] : memref<1x32xf32, #tpu.memory_space<vmem>>, vector<1x32xf32>
    %12 = vector.broadcast %11 : vector<1x32xf32> to vector<8x32xf32>
    %13 = arith.addf %10, %12 : vector<8x32xf32>
    %c0_6 = arith.constant 0 : index
    %c0_7 = arith.constant 0 : index
    %c0_8 = arith.constant 0 : index
    %14 = vector.load %arg3[%c0_6, %c0_7, %c0_8] : memref<1x1x8xf32, #tpu.memory_space<vmem>>, vector<1x1x8xf32>
    %15 = vector.shape_cast %14 : vector<1x1x8xf32> to vector<1x8xf32>
    %cst_9 = arith.constant 1.000000e+00 : f32
    %16 = vector.broadcast %cst_9 : f32 to vector<1x8xf32>
    %17 = arith.subf %16, %15 : vector<1x8xf32>
    %cst_10 = arith.constant -1.000000e+04 : f32
    %18 = vector.broadcast %cst_10 : f32 to vector<1x8xf32>
    %19 = arith.mulf %17, %18 : vector<1x8xf32>
    %20 = vector.extract_strided_slice %13 {offsets = [0, 0], sizes = [8, 8], strides = [1, 1]} : vector<8x32xf32> to vector<8x8xf32>
    %21 = arith.truncf %20 : vector<8x8xf32> to vector<8x8xbf16>
    %c0_11 = arith.constant 0 : index
    %c0_12 = arith.constant 0 : index
    %22 = vector.load %arg13[%c0_11, %c0_12] : memref<8x64xbf16, #tpu.memory_space<vmem>>, vector<8x8xbf16>
    %c0_13 = arith.constant 0 : index
    %c32 = arith.constant 32 : index
    %23 = vector.load %arg13[%c0_13, %c32] : memref<8x64xbf16, #tpu.memory_space<vmem>>, vector<8x8xbf16>
    %cst_14 = arith.constant dense<0.000000e+00> : vector<8x8xf32>
    %24 = tpu.matmul %21, %22, %cst_14 {dimension_numbers = #tpu.dot_dimension_numbers<[1], [1], [0], [0], [0, 0, 1, 0], [], []>} : vector<8x8xbf16>, vector<8x8xbf16>, vector<8x8xf32> -> vector<8x8xf32>
    %25 = vector.broadcast %19 : vector<1x8xf32> to vector<8x8xf32>
    %26 = arith.addf %24, %25 : vector<8x8xf32>
    %cst_15 = arith.constant dense<0xFF800000> : vector<8xf32>
    %27 = vector.multi_reduction <maximumf>, %26, %cst_15 [1] : vector<8x8xf32> to vector<8xf32>
    %28 = vector.shape_cast %27 : vector<8xf32> to vector<8x1xf32>
    %29 = vector.broadcast %28 : vector<8x1xf32> to vector<8x8xf32>
    %30 = arith.subf %26, %29 : vector<8x8xf32>
    %31 = math.exp %30 : vector<8x8xf32>
    %cst_16 = arith.constant dense<0.000000e+00> : vector<8xf32>
    %32 = vector.multi_reduction <add>, %31, %cst_16 [1] : vector<8x8xf32> to vector<8xf32>
    %33 = vector.shape_cast %32 : vector<8xf32> to vector<8x1xf32>
    %34 = tpu.reciprocal %33 {approx = true} : vector<8x1xf32> -> vector<8x1xf32>
    %35 = arith.truncf %31 : vector<8x8xf32> to vector<8x8xbf16>
    %cst_17 = arith.constant dense<0.000000e+00> : vector<8x8xf32>
    %36 = tpu.matmul %35, %23, %cst_17 {dimension_numbers = #tpu.dot_dimension_numbers<[1], [0], [0], [1], [0, 0, 1, 1], [], []>} : vector<8x8xbf16>, vector<8x8xbf16>, vector<8x8xf32> -> vector<8x8xf32>
    %37 = vector.broadcast %34 : vector<8x1xf32> to vector<8x8xf32>
    %38 = arith.mulf %36, %37 : vector<8x8xf32>
    %c0_18 = arith.constant 0 : index
    %c0_19 = arith.constant 0 : index
    %39 = vector.load %arg14[%c0_18, %c0_19] : memref<8x32xf32, #tpu.memory_space<vmem>>, vector<8x8xf32>
    tpu.vector_store %arg14[%c0_18, %c0_19], %38 {strides = array<i32>} : memref<8x32xf32, #tpu.memory_space<vmem>>, vector<8x8xf32>,
    %40 = vector.extract_strided_slice %13 {offsets = [0, 8], sizes = [8, 8], strides = [1, 1]} : vector<8x32xf32> to vector<8x8xf32>
    %41 = arith.truncf %40 : vector<8x8xf32> to vector<8x8xbf16>
    %c0_20 = arith.constant 0 : index
    %c8 = arith.constant 8 : index
    %42 = vector.load %arg13[%c0_20, %c8] : memref<8x64xbf16, #tpu.memory_space<vmem>>, vector<8x8xbf16>
    %c0_21 = arith.constant 0 : index
    %c40 = arith.constant 40 : index
    %43 = vector.load %arg13[%c0_21, %c40] : memref<8x64xbf16, #tpu.memory_space<vmem>>, vector<8x8xbf16>
    %cst_22 = arith.constant dense<0.000000e+00> : vector<8x8xf32>
    %44 = tpu.matmul %41, %42, %cst_22 {dimension_numbers = #tpu.dot_dimension_numbers<[1], [1], [0], [0], [0, 0, 1, 0], [], []>} : vector<8x8xbf16>, vector<8x8xbf16>, vector<8x8xf32> -> vector<8x8xf32>
    %45 = vector.broadcast %19 : vector<1x8xf32> to vector<8x8xf32>
    %46 = arith.addf %44, %45 : vector<8x8xf32>
    %cst_23 = arith.constant dense<0xFF800000> : vector<8xf32>
    %47 = vector.multi_reduction <maximumf>, %46, %cst_23 [1] : vector<8x8xf32> to vector<8xf32>
    %48 = vector.shape_cast %47 : vector<8xf32> to vector<8x1xf32>
    %49 = vector.broadcast %48 : vector<8x1xf32> to vector<8x8xf32>
    %50 = arith.subf %46, %49 : vector<8x8xf32>
    %51 = math.exp %50 : vector<8x8xf32>
    %cst_24 = arith.constant dense<0.000000e+00> : vector<8xf32>
    %52 = vector.multi_reduction <add>, %51, %cst_24 [1] : vector<8x8xf32> to vector<8xf32>
    %53 = vector.shape_cast %52 : vector<8xf32> to vector<8x1xf32>
    %54 = tpu.reciprocal %53 {approx = true} : vector<8x1xf32> -> vector<8x1xf32>
    %55 = arith.truncf %51 : vector<8x8xf32> to vector<8x8xbf16>
    %cst_25 = arith.constant dense<0.000000e+00> : vector<8x8xf32>
    %56 = tpu.matmul %55, %43, %cst_25 {dimension_numbers = #tpu.dot_dimension_numbers<[1], [0], [0], [1], [0, 0, 1, 1], [], []>} : vector<8x8xbf16>, vector<8x8xbf16>, vector<8x8xf32> -> vector<8x8xf32>
    %57 = vector.broadcast %54 : vector<8x1xf32> to vector<8x8xf32>
    %58 = arith.mulf %56, %57 : vector<8x8xf32>
    %c0_26 = arith.constant 0 : index
    %c8_27 = arith.constant 8 : index
    %59 = vector.load %arg14[%c0_26, %c8_27] : memref<8x32xf32, #tpu.memory_space<vmem>>, vector<8x8xf32>
    tpu.vector_store %arg14[%c0_26, %c8_27], %58 {strides = array<i32>} : memref<8x32xf32, #tpu.memory_space<vmem>>, vector<8x8xf32>,
    %60 = vector.extract_strided_slice %13 {offsets = [0, 16], sizes = [8, 8], strides = [1, 1]} : vector<8x32xf32> to vector<8x8xf32>
    %61 = arith.truncf %60 : vector<8x8xf32> to vector<8x8xbf16>
    %c0_28 = arith.constant 0 : index
    %c16 = arith.constant 16 : index
    %62 = vector.load %arg13[%c0_28, %c16] : memref<8x64xbf16, #tpu.memory_space<vmem>>, vector<8x8xbf16>
    %c0_29 = arith.constant 0 : index
    %c48 = arith.constant 48 : index
    %63 = vector.load %arg13[%c0_29, %c48] : memref<8x64xbf16, #tpu.memory_space<vmem>>, vector<8x8xbf16>
    %cst_30 = arith.constant dense<0.000000e+00> : vector<8x8xf32>
    %64 = tpu.matmul %61, %62, %cst_30 {dimension_numbers = #tpu.dot_dimension_numbers<[1], [1], [0], [0], [0, 0, 1, 0], [], []>} : vector<8x8xbf16>, vector<8x8xbf16>, vector<8x8xf32> -> vector<8x8xf32>
    %65 = vector.broadcast %19 : vector<1x8xf32> to vector<8x8xf32>
    %66 = arith.addf %64, %65 : vector<8x8xf32>
    %cst_31 = arith.constant dense<0xFF800000> : vector<8xf32>
    %67 = vector.multi_reduction <maximumf>, %66, %cst_31 [1] : vector<8x8xf32> to vector<8xf32>
    %68 = vector.shape_cast %67 : vector<8xf32> to vector<8x1xf32>
    %69 = vector.broadcast %68 : vector<8x1xf32> to vector<8x8xf32>
    %70 = arith.subf %66, %69 : vector<8x8xf32>
    %71 = math.exp %70 : vector<8x8xf32>
    %cst_32 = arith.constant dense<0.000000e+00> : vector<8xf32>
    %72 = vector.multi_reduction <add>, %71, %cst_32 [1] : vector<8x8xf32> to vector<8xf32>
    %73 = vector.shape_cast %72 : vector<8xf32> to vector<8x1xf32>
    %74 = tpu.reciprocal %73 {approx = true} : vector<8x1xf32> -> vector<8x1xf32>
    %75 = arith.truncf %71 : vector<8x8xf32> to vector<8x8xbf16>
    %cst_33 = arith.constant dense<0.000000e+00> : vector<8x8xf32>
    %76 = tpu.matmul %75, %63, %cst_33 {dimension_numbers = #tpu.dot_dimension_numbers<[1], [0], [0], [1], [0, 0, 1, 1], [], []>} : vector<8x8xbf16>, vector<8x8xbf16>, vector<8x8xf32> -> vector<8x8xf32>
    %77 = vector.broadcast %74 : vector<8x1xf32> to vector<8x8xf32>
    %78 = arith.mulf %76, %77 : vector<8x8xf32>
    %c0_34 = arith.constant 0 : index
    %c16_35 = arith.constant 16 : index
    %79 = vector.load %arg14[%c0_34, %c16_35] : memref<8x32xf32, #tpu.memory_space<vmem>>, vector<8x8xf32>
    tpu.vector_store %arg14[%c0_34, %c16_35], %78 {strides = array<i32>} : memref<8x32xf32, #tpu.memory_space<vmem>>, vector<8x8xf32>,
    %80 = vector.extract_strided_slice %13 {offsets = [0, 24], sizes = [8, 8], strides = [1, 1]} : vector<8x32xf32> to vector<8x8xf32>
    %81 = arith.truncf %80 : vector<8x8xf32> to vector<8x8xbf16>
    %c0_36 = arith.constant 0 : index
    %c24 = arith.constant 24 : index
    %82 = vector.load %arg13[%c0_36, %c24] : memref<8x64xbf16, #tpu.memory_space<vmem>>, vector<8x8xbf16>
    %c0_37 = arith.constant 0 : index
    %c56 = arith.constant 56 : index
    %83 = vector.load %arg13[%c0_37, %c56] : memref<8x64xbf16, #tpu.memory_space<vmem>>, vector<8x8xbf16>
    %cst_38 = arith.constant dense<0.000000e+00> : vector<8x8xf32>
    %84 = tpu.matmul %81, %82, %cst_38 {dimension_numbers = #tpu.dot_dimension_numbers<[1], [1], [0], [0], [0, 0, 1, 0], [], []>} : vector<8x8xbf16>, vector<8x8xbf16>, vector<8x8xf32> -> vector<8x8xf32>
    %85 = vector.broadcast %19 : vector<1x8xf32> to vector<8x8xf32>
    %86 = arith.addf %84, %85 : vector<8x8xf32>
    %cst_39 = arith.constant dense<0xFF800000> : vector<8xf32>
    %87 = vector.multi_reduction <maximumf>, %86, %cst_39 [1] : vector<8x8xf32> to vector<8xf32>
    %88 = vector.shape_cast %87 : vector<8xf32> to vector<8x1xf32>
    %89 = vector.broadcast %88 : vector<8x1xf32> to vector<8x8xf32>
    %90 = arith.subf %86, %89 : vector<8x8xf32>
    %91 = math.exp %90 : vector<8x8xf32>
    %cst_40 = arith.constant dense<0.000000e+00> : vector<8xf32>
    %92 = vector.multi_reduction <add>, %91, %cst_40 [1] : vector<8x8xf32> to vector<8xf32>
    %93 = vector.shape_cast %92 : vector<8xf32> to vector<8x1xf32>
    %94 = tpu.reciprocal %93 {approx = true} : vector<8x1xf32> -> vector<8x1xf32>
    %95 = arith.truncf %91 : vector<8x8xf32> to vector<8x8xbf16>
    %cst_41 = arith.constant dense<0.000000e+00> : vector<8x8xf32>
    %96 = tpu.matmul %95, %83, %cst_41 {dimension_numbers = #tpu.dot_dimension_numbers<[1], [0], [0], [1], [0, 0, 1, 1], [], []>} : vector<8x8xbf16>, vector<8x8xbf16>, vector<8x8xf32> -> vector<8x8xf32>
    %97 = vector.broadcast %94 : vector<8x1xf32> to vector<8x8xf32>
    %98 = arith.mulf %96, %97 : vector<8x8xf32>
    %c0_42 = arith.constant 0 : index
    %c24_43 = arith.constant 24 : index
    %99 = vector.load %arg14[%c0_42, %c24_43] : memref<8x32xf32, #tpu.memory_space<vmem>>, vector<8x8xf32>
    tpu.vector_store %arg14[%c0_42, %c24_43], %98 {strides = array<i32>} : memref<8x32xf32, #tpu.memory_space<vmem>>, vector<8x8xf32>,
    %c0_44 = arith.constant 0 : index
    %c0_45 = arith.constant 0 : index
    %100 = vector.load %arg14[%c0_44, %c0_45] : memref<8x32xf32, #tpu.memory_space<vmem>>, vector<8x32xf32>
    %101 = arith.truncf %100 : vector<8x32xf32> to vector<8x32xbf16>
    %c0_46 = arith.constant 0 : index
    %c0_47 = arith.constant 0 : index
    %102 = vector.load %arg8[%c0_46, %c0_47] : memref<32x32xbf16, #tpu.memory_space<vmem>>, vector<32x32xbf16>
    %cst_48 = arith.constant dense<0.000000e+00> : vector<8x32xf32>
    %103 = tpu.matmul %101, %102, %cst_48 {dimension_numbers = #tpu.dot_dimension_numbers<[1], [0], [0], [1], [0, 0, 1, 1], [], []>} : vector<8x32xbf16>, vector<32x32xbf16>, vector<8x32xf32> -> vector<8x32xf32>
    %c0_49 = arith.constant 0 : index
    %c0_50 = arith.constant 0 : index
    %104 = vector.load %arg9[%c0_49, %c0_50] : memref<1x32xf32, #tpu.memory_space<vmem>>, vector<1x32xf32>
    %105 = vector.broadcast %104 : vector<1x32xf32> to vector<8x32xf32>
    %106 = arith.addf %103, %105 : vector<8x32xf32>
    %107 = arith.addf %106, %7 : vector<8x32xf32>
    %cst_51 = arith.constant dense<0.000000e+00> : vector<8xf32>
    %108 = vector.multi_reduction <add>, %107, %cst_51 [1] : vector<8x32xf32> to vector<8xf32>
    %109 = vector.shape_cast %108 : vector<8xf32> to vector<8x1xf32>
    %cst_52 = arith.constant 3.200000e+01 : f32
    %110 = vector.broadcast %cst_52 : f32 to vector<8x1xf32>
    %111 = arith.divf %109, %110 : vector<8x1xf32>
    %112 = vector.broadcast %111 : vector<8x1xf32> to vector<8x32xf32>
    %113 = arith.subf %107, %112 : vector<8x32xf32>
    %114 = arith.mulf %113, %113 : vector<8x32xf32>
    %cst_53 = arith.constant dense<0.000000e+00> : vector<8xf32>
    %115 = vector.multi_reduction <add>, %114, %cst_53 [1] : vector<8x32xf32> to vector<8xf32>
    %116 = vector.shape_cast %115 : vector<8xf32> to vector<8x1xf32>
    %cst_54 = arith.constant 3.200000e+01 : f32
    %117 = vector.broadcast %cst_54 : f32 to vector<8x1xf32>
    %118 = arith.divf %116, %117 : vector<8x1xf32>
    %cst_55 = arith.constant 9.99999996E-13 : f32
    %119 = vector.broadcast %cst_55 : f32 to vector<8x1xf32>
    %120 = arith.addf %118, %119 : vector<8x1xf32>
    %121 = math.rsqrt %120 : vector<8x1xf32>
    %122 = vector.broadcast %121 : vector<8x1xf32> to vector<8x32xf32>
    %123 = arith.mulf %113, %122 : vector<8x32xf32>
    %c0_56 = arith.constant 0 : index
    %c0_57 = arith.constant 0 : index
    %124 = vector.load %arg10[%c0_56, %c0_57] : memref<1x32xf32, #tpu.memory_space<vmem>>, vector<1x32xf32>
    %125 = vector.broadcast %124 : vector<1x32xf32> to vector<8x32xf32>
    %126 = arith.mulf %123, %125 : vector<8x32xf32>
    %c0_58 = arith.constant 0 : index
    %c0_59 = arith.constant 0 : index
    %127 = vector.load %arg11[%c0_58, %c0_59] : memref<1x32xf32, #tpu.memory_space<vmem>>, vector<1x32xf32>
    %128 = vector.broadcast %127 : vector<1x32xf32> to vector<8x32xf32>
    %129 = arith.addf %126, %128 : vector<8x32xf32>
    %c0_60 = arith.constant 0 : index
    %c0_61 = arith.constant 0 : index
    %c0_62 = arith.constant 0 : index
    %130 = vector.load %arg12[%c0_60, %c0_61, %c0_62] : memref<1x8x32xf32, #tpu.memory_space<vmem>>, vector<1x8x32xf32>
    %131 = vector.shape_cast %130 : vector<1x8x32xf32> to vector<8x32xf32>
    %132 = vector.shape_cast %129 : vector<8x32xf32> to vector<1x8x32xf32>
    tpu.vector_store %arg12[%c0_60, %c0_61, %c0_62], %132 {strides = array<i32>} : memref<1x8x32xf32, #tpu.memory_space<vmem>>, vector<1x8x32xf32>,
    return
  }
  func.func @transform_0(%arg0: i32, %arg1: i32) -> (i32, i32, i32) {
    %c0_i32 = arith.constant 0 : i32
    %c0_i32_0 = arith.constant 0 : i32
    %c0_i32_1 = arith.constant 0 : i32
    return %arg0, %c0_i32, %c0_i32_0 : i32, i32, i32
  }
  func.func @transform_1(%arg0: i32, %arg1: i32) -> (i32, i32, i32) {
    %c0_i32 = arith.constant 0 : i32
    %c0_i32_0 = arith.constant 0 : i32
    %c0_i32_1 = arith.constant 0 : i32
    return %arg0, %c0_i32, %c0_i32_0 : i32, i32, i32
  }
  func.func @transform_2(%arg0: i32, %arg1: i32) -> (i32, i32) {
    %c0_i32 = arith.constant 0 : i32
    %c0_i32_0 = arith.constant 0 : i32
    %c0_i32_1 = arith.constant 0 : i32
    return %c0_i32, %c0_i32_0 : i32, i32
  }
  func.func @transform_3(%arg0: i32, %arg1: i32) -> (i32, i32) {
    %c0_i32 = arith.constant 0 : i32
    %c0_i32_0 = arith.constant 0 : i32
    %c0_i32_1 = arith.constant 0 : i32
    return %c0_i32, %c0_i32_0 : i32, i32
  }
  func.func @transform_4(%arg0: i32, %arg1: i32) -> (i32, i32) {
    %c0_i32 = arith.constant 0 : i32
    %c0_i32_0 = arith.constant 0 : i32
    %c0_i32_1 = arith.constant 0 : i32
    return %c0_i32, %c0_i32_0 : i32, i32
  }
  func.func @transform_5(%arg0: i32, %arg1: i32) -> (i32, i32) {
    %c0_i32 = arith.constant 0 : i32
    %c0_i32_0 = arith.constant 0 : i32
    %c0_i32_1 = arith.constant 0 : i32
    return %c0_i32, %c0_i32_0 : i32, i32
  }
  func.func @transform_6(%arg0: i32, %arg1: i32) -> (i32, i32) {
    %c0_i32 = arith.constant 0 : i32
    %c0_i32_0 = arith.constant 0 : i32
    %c0_i32_1 = arith.constant 0 : i32
    return %c0_i32, %c0_i32_0 : i32, i32
  }
  func.func @transform_7(%arg0: i32, %arg1: i32) -> (i32, i32) {
    %c0_i32 = arith.constant 0 : i32
    %c0_i32_0 = arith.constant 0 : i32
    %c0_i32_1 = arith.constant 0 : i32
    return %c0_i32, %c0_i32_0 : i32, i32
  }
  func.func @transform_8(%arg0: i32, %arg1: i32) -> (i32, i32) {
    %c0_i32 = arith.constant 0 : i32
    %c0_i32_0 = arith.constant 0 : i32
    %c0_i32_1 = arith.constant 0 : i32
    return %c0_i32, %c0_i32_0 : i32, i32
  }
  func.func @transform_9(%arg0: i32, %arg1: i32) -> (i32, i32) {
    %c0_i32 = arith.constant 0 : i32
    %c0_i32_0 = arith.constant 0 : i32
    %c0_i32_1 = arith.constant 0 : i32
    return %c0_i32, %c0_i32_0 : i32, i32
  }
  func.func @transform_10(%arg0: i32, %arg1: i32) -> (i32, i32, i32) {
    %c0_i32 = arith.constant 0 : i32
    %c0_i32_0 = arith.constant 0 : i32
    return %arg0, %arg1, %c0_i32 : i32, i32, i32
  }
}

</mosaic_0001>

<bundles_post_ra>
// kernel: tpu_custom_call.1
= control target key start
LH: loop header
LB: loop body
LE: loop exit
PB: predicated region body
PF: predicated region fallthrough
CT: control target
= control target key end

     0   :  { %s2239_s0 = inlined_call_operand.hbm [shape: f32[2,8,32], index: 0, kind: input, shape index: {}]   ;;  %s2240_s1 = inlined_call_operand.hbm [shape: f32[2,1,8], index: 1, kind: input, shape index: {}]   ;;  %s2241_s2 = inlined_call_operand.hbm [shape: bf16[32,32], index: 2, kind: input, shape index: {}]   ;;  %s2242_s3 = inlined_call_operand.vmem [shape: f32[1,32], index: 3, kind: input, shape index: {}]   ;;  %s2243_s4 = inlined_call_operand.hbm [shape: bf16[32,64], index: 4, kind: input, shape index: {}]   ;;  %s2244_s5 = inlined_call_operand.vmem [shape: f32[1,64], index: 5, kind: input, shape index: {}]   ;;  %s2245_s6 = inlined_call_operand.hbm [shape: bf16[32,32], index: 6, kind: input, shape index: {}]   ;;  %s2246_s7 = inlined_call_operand.vmem [shape: f32[1,32], index: 7, kind: input, shape index: {}]   ;;  %s2247_s8 = inlined_call_operand.vmem [shape: f32[1,32], index: 8, kind: input, shape index: {}]   ;;  %s2248_s9 = inlined_call_operand.vmem [shape: f32[1,32], index: 9, kind: input, shape index: {}]   ;;  %s2249_s10 = inlined_call_operand.hbm [shape: f32[2,8,32], index: 10, kind: output, shape index: {}]  }
   0x1   :  { %2258 = sst [smem:[#allocation25_spill]] %s2239_s0 }
   0x2   :  { %2259 = sst [smem:[#allocation26_spill]] %s2241_s2 }
   0x3   :  { %2260 = sst [smem:[#allocation27_spill]] %s2243_s4 }
   0x4   :  { %2261 = sst [smem:[#allocation28_spill]] %s2245_s6 }
   0x5   :  { %15 = vsyncpa [#allocation5], 0 }
   0x6   :  { %17 = vsyncpa [#allocation5 + $0x1], 0 }
   0x7   :  { %18 = vsyncpa [#allocation8], 0 }
   0x8   :  { %20 = vsyncpa [#allocation8 + $0x1], 0 }
   0x9   :  { %21 = vsyncpa [#allocation11], 0 }
   0xa   :  { %22 = vsyncpa [#allocation6], 0 }
   0xb   :  { %24 = vsyncpa [#allocation6 + $0x1], 0  ;;  %s1928_s13 = smov 0   ;;  %s1930_s14 = smov 0  }
   0xc   :  { %s1932_s15 = smov 0   ;;  %s1934_s16 = smov 0  }
   0xd   :  { %s1936_s17 = smov 0   ;;  %s1938_s18 = smov 0  }
   0xe LB: > { %2262 = sst [smem:[#allocation19_spill]] %s1831_s13  ;;  %s1959_s19 = sadd.s32 4294967295, %s1851_s18   ;;  %s1851_s18 = sphi %s1938_s18, %s30_s18   ;;  %s1847_s17 = sphi %s1936_s17, %s2295_s17   ;;  %s1843_s16 = sphi %s1934_s16, %s2294_s16   ;;  %s1839_s15 = sphi %s1932_s15, %s2290_s15   ;;  %s1835_s14 = sphi %s1930_s14, %s2293_s14   ;;  %s1831_s13 = sphi %s1928_s13, %s2292_s13  }
   0xf   : > { %2263 = sst [smem:[#allocation20_spill]] %s1839_s15  ;;  %s1343_s20 = sadd.s32 4294967294, %s1851_s18  }
  0x10   : > { %2264 = sst [smem:[#allocation21_spill]] %s1851_s18  ;;  %p62_p0 = scmp.ne.s32.totalorder %s1835_s14, %s1831_s13 }
  0x11   : > { %p2250_p1 = scmp.eq.s32.totalorder %s1959_s19, 0  ;;  %p288_p3 = scmp.eq.s32.totalorder %s1343_s20, 1 }
  0x12   : > { %p1344_p5 = scmp.ge.s32.totalorder %s1851_s18, 1  ;;  %p295_p7 = scmp.lt.s32.totalorder %s1851_s18, 3 }
  0x13   : > { %p1968_p4 = por %p2250_p1, %p62_p0  ;;  %p1973_p6 = por %p288_p3, %p62_p0 }
  0x14   : > { %p1978_p8 = pnand %p1344_p5, %p295_p7  ;;  %s1853_s24 = smov [#allocation9]  }
  0x15   : > { %s2265_s21 = scalar_select %p1968_p4, 1, 0 }
  0x16   : > { %s2266_s22 = scalar_select %p1973_p6, 1, 0 }
  0x17   : > { %s307_s25 = sshll.u32 %s1853_s24, 4  ;;  %p1503_p9 = pneg %p1978_p8  ;;  %s308_s25 = int_to_ptr.vmem [resolvable:$true] %s307_s25 }
  0x18   : > { %2267 = sst [smem:[#allocation22_spill]] %s2266_s22  ;;  %s1854_s27 = smov [#allocation10]  }
  0x19   : > { %p1987_p11 = pnand %p1503_p9, %p2250_p1  ;;  %s323_s28 = sshll.u32 %s1854_s27, 4  ;;  %s324_s28 = int_to_ptr.vmem [resolvable:$true] %s323_s28 }
  0x1a   : > { %s1855_s29 = smov [#allocation12]   ;;  %s1636_s11 = scalar_lea.vmem %s308_s25, 256 }
  0x1b   : > { %s339_s30 = sshll.u32 %s1855_s29, 4  ;;  %p1627_p12 = pneg %p1987_p11  ;;  %s340_s30 = int_to_ptr.vmem [resolvable:$true] %s339_s30 }
  0x1c   : > { %p1637_p13 = scmp.ne.s32.totalorder %s308_s25, %s1636_s11  ;;  %p1644_p5 = scmp.lt.s32.totalorder %s308_s25, %s308_s25 }
  0x1d   : > { %p1645_p7 = scmp.lt.s32.totalorder %s1636_s11, %s1636_s11 }
  0x1e   : > { %p1639_p0 = pnand %p1637_p13, %p1627_p12 }
  0x1f   : > { %p1646_p9 = por %p1645_p7, %p1644_p5 }
  0x20   : > { %p1640_p3 = pneg %p1639_p0 }
  0x22   : > { %p1647_p10 = pnand %p1646_p9, %p1640_p3 }
  0x24   : > { %1650 = shalt.err (!%p1647_p10)
}
  0x25   : > { %s1856_s12 = smov 64   ;;  %s1857_s20 = smov 4  }
  0x26   : > { %s2270_s2 = sld [smem:[#allocation26_spill]]  ;;  %s1662_s29 = scalar_lea.vmem %s324_s28, 256 }
  0x27   : > { %p1663_p1 = scmp.ne.s32.totalorder %s324_s28, %s1662_s29  ;;  %p1670_p2 = scmp.lt.s32.totalorder %s324_s28, %s324_s28 }
  0x28   : > { %p1671_p6 = scmp.lt.s32.totalorder %s1662_s29, %s1662_s29 }
  0x29   : > { %p1665_p13 = pnand %p1663_p1, %p1627_p12 }
  0x2a   : > { %p1672_p5 = por %p1671_p6, %p1670_p2 }
  0x2b   : > { %p1666_p0 = pneg %p1665_p13 }
  0x2c   : > { %1506 = dma.hbm_to_vmem [thread:$0]  (!%p1987_p11), %s2270_s2, 256, %s308_s25, [#allocation8], %s1856_s12, %s1856_s12, %s1857_s20  }
  0x2d   : > { %p1673_p3 = pnand %p1672_p5, %p1666_p0 }
  0x2f   : > { %1676 = shalt.err (!%p1673_p3)
}
  0x30   : > { %s2271_s4 = sld [smem:[#allocation27_spill]]  ;;  %s1688_s25 = scalar_lea.vmem %s340_s30, 256 }
  0x31   : > { %p1689_p10 = scmp.ne.s32.totalorder %s340_s30, %s1688_s25  ;;  %p1696_p9 = scmp.lt.s32.totalorder %s340_s30, %s340_s30 }
  0x32   : > { %p1697_p13 = scmp.lt.s32.totalorder %s1688_s25, %s1688_s25 }
  0x33   : > { %p1691_p7 = pnand %p1689_p10, %p1627_p12 }
  0x34   : > { %p1698_p4 = por %p1697_p13, %p1696_p9 }
  0x35   : > { %p1692_p1 = pneg %p1691_p7 }
  0x36   : > { %1509 = dma.hbm_to_vmem [thread:$0]  (!%p1987_p11), %s2271_s4, 256, %s324_s28, [#allocation11], %s1856_s12, %s1856_s12, %s1857_s20  }
  0x37   : > { %p1699_p2 = pnand %p1698_p4, %p1692_p1 }
  0x39   : > { %1702 = shalt.err (!%p1699_p2)
}
  0x3a   : > { %s2272_s6 = sld [smem:[#allocation28_spill]]  ;;  %s49_s22 = sadd.s32 1, %s1839_s15 }
  0x3b   : > { %s42_s28 = sadd.s32 1, %s1847_s17  ;;  %p56_p4 = scmp.ne.s32.totalorder %s1839_s15, %s1835_s14 }
  0x3c   : > { %p44_p6 = scmp.ge.s32.totalorder %s42_s28, 2  ;;  %p57_p12 = scmp.eq.s32.totalorder %s1851_s18, 0 }
  0x3d   : > { %p2273_p0 = scmp.eq.s32.totalorder %s1959_s19, 1  ;;  %p1527_p3 = scmp.lt.s32.totalorder %s1851_s18, 2 }
  0x3e   : > { %s2297_s28 = smov (%p44_p6, %s42_s28), 0  ;;  %p58_p10 = por %p57_p12, %p56_p4 }
  0x3f   : > { %p2024_p5 = por %p2273_p0, %p56_p4  ;;  %2275 = sst [smem:[#allocation23_spill]] %s2297_s28 }
  0x40   : > { %1512 = dma.hbm_to_vmem [thread:$0]  (!%p1987_p11), %s2272_s6, 256, %s340_s30, [#allocation11], %s1856_s12, %s1856_s12, %s1857_s20  }
  0x41   : > { %s2032_s29 = sand.u32 1, %s1839_s15   ;;  %s46_s30 = ssub.s32 %s1847_s17, %s2297_s28 }
  0x42   : > { %p47_p11 = scmp.eq.s32.totalorder %s46_s30, 0  ;;  %s1349_s12 = sshll.u32 %s2032_s29, 3 }
  0x43   : > { %s1350_s20 = sshll.u32 %s1847_s17, 7  ;;  %s2277_s0 = sld [smem:[#allocation25_spill]] }
  0x44   : > { %s2039_s11 = scalar_select %p47_p11, %s1839_s15, %s49_s22  }
  0x45   : > { %s366_s2 = scalar_lea.vmem [#allocation4], %s1349_s12  ;;  %p2046_p7 = pnand %p1527_p3, %p58_p10 }
  0x46   : > { %2276 = sst [smem:[#allocation24_spill]] %s2039_s11  ;;  %s373_s4 = sshll.u32 %s366_s2, 4  ;;  %s374_s4 = int_to_ptr.vmem [resolvable:$true] %s373_s4 }
  0x47   : > { %s380_s28 = sand.u32 1, %s1851_s18   ;;  %s363_s30 = scalar_lea.sflag [#allocation5], %s2032_s29 }
  0x48   : > { %p1705_p1 = pneg %p2046_p7  ;;  %s1716_s22 = scalar_lea.vmem %s374_s4, 128 }
  0x49   : > { %s371_s27 = scalar_lea.hbm %s2277_s0, %s1350_s20  ;;  %p1717_p9 = scmp.ne.s32.totalorder %s374_s4, %s1716_s22 }
  0x4a   : > { %s1858_s12 = smov [#allocation4]  }
  0x4b   : > { %p1719_p13 = pnand %p1717_p9, %p1705_p1  ;;  %s1721_s2 = sshll.u32 %s1858_s12, 4  ;;  %s1722_s2 = int_to_ptr.vmem [resolvable:$false] %s1721_s2 }
  0x4c   : > { %s1723_s20 = scalar_lea.vmem %s1722_s2, 256  ;;  %p1724_p4 = scmp.lt.s32.totalorder %s374_s4, %s1722_s2 }
  0x4d   : > { %p1720_p2 = pneg %p1719_p13  ;;  %p1725_p6 = scmp.lt.s32.totalorder %s1723_s20, %s1716_s22 }
  0x4f   : > { %p1726_p12 = por %p1725_p6, %p1724_p4 }
  0x51   : > { %p1727_p0 = pnand %p1726_p12, %p1720_p2 }
  0x53   : > { %1730 = shalt.err (!%p1727_p0)
}
  0x54   : > { %1516 = dma.hbm_to_vmem [thread:$0]  (!%p2046_p7), %s371_s27, 128, %s374_s4, %s363_s30  }
  0x55   : > { %s1351_s25 = sshll.u32 %s1847_s17, 4  ;;  %s383_s24 = scalar_lea.vmem [#allocation7], %s2032_s29 }
  0x56   : > { %s390_s0 = sshll.u32 %s383_s24, 4  ;;  %s388_s12 = scalar_lea.hbm %s2240_s1, %s1351_s25  ;;  %s391_s0 = int_to_ptr.vmem [resolvable:$true] %s390_s0 }
  0x57   : > { %s381_s18 = scalar_lea.sflag [#allocation8], %s380_s28  ;;  %s1744_s2 = scalar_lea.vmem %s391_s0, 16 }
  0x58   : > { %p1745_p3 = scmp.ne.s32.totalorder %s391_s0, %s1744_s2  ;;  %s1859_s22 = smov [#allocation7]  }
  0x59   : > { %s1749_s20 = sshll.u32 %s1859_s22, 4  ;;  %s1750_s20 = int_to_ptr.vmem [resolvable:$false] %s1749_s20 }
  0x5a   : > { %p1747_p10 = pnand %p1745_p3, %p1705_p1  ;;  %s1751_s13 = scalar_lea.vmem %s1750_s20, 32 }
  0x5b   : > { %p1752_p9 = scmp.lt.s32.totalorder %s391_s0, %s1750_s20  ;;  %p1753_p13 = scmp.lt.s32.totalorder %s1751_s13, %s1744_s2 }
  0x5c   : > { %p1748_p11 = pneg %p1747_p10 }
  0x5d   : > { %p1754_p2 = por %p1753_p13, %p1752_p9 }
  0x5f   : > { %p1755_p4 = pnand %p1754_p2, %p1748_p11 }
  0x61   : > { %1758 = shalt.err (!%p1755_p4)
}
  0x62   : > { %1519 = dma.hbm_to_vmem [thread:$0]  (!%p2046_p7), %s388_s12, 16, %s391_s0, %s381_s18  }
  0x63   : > { %399 = sbr.rel (%p1978_p8) target bundleno = 1667 (0x683), region = 60  ;;  %s2072_s4 = sand.u32 (!%p1978_p8), 1, %s1835_s14  }
  0x64   : > { %s1353_s15 = sshll.u32 (!%p1978_p8), %s2072_s4, 3  ;;  %s402_s28 = scalar_lea.sflag (!%p1978_p8), [#allocation5], %s2072_s4 }
  0x65   : > { %s405_s13 = scalar_lea.vmem (!%p1978_p8), [#allocation4], %s1353_s15  ;;  %p2279_p1 = scmp.ne.s32.totalorder (!%p1978_p8), %s2265_s21, 0 }
  0x68   : > { %1810 = dma.done.wait (%p2279_p1), %s402_s28, 128  }
  0x69   : > { %1812 = vsyncadd (%p2279_p1), %s402_s28, 4294967168  ;;  %s410_s0 = sand.u32 1, %s1959_s19   ;;  %s413_s18 = scalar_lea.vmem [#allocation7], %s2072_s4 }
  0x6a   : > { %s411_s6 = scalar_lea.sflag [#allocation8], %s410_s0 }
  0x6b   : > { %1814 = dma.done.wait (%p2279_p1), %s411_s6, 16  }
  0x6c   : > { %1816 = vsyncadd (%p2279_p1), %s411_s6, 4294967280  ;;  %p2280_p8 = scmp.eq.s32.totalorder %s1959_s19, 0 }
  0x6e   : > { %1818 = dma.done.wait (%p2280_p8), [#allocation8], 256   ;;  %p2281_p7 = pmov %p2280_p8 }
  0x70   : > { %1820 = vsyncadd (%p2281_p7), [#allocation8], 4294967040  ;;  %p2282_p6 = pmov %p2281_p7 }
  0x72   : > { %1822 = dma.done.wait (%p2282_p6), [#allocation11], 512   ;;  %p2283_p12 = pmov %p2282_p6 }
  0x73   : > { %v1860_v0 = vmov 0.0   ;;  %vm1861_vm0 = vmmov 0   ;;  %v1597_v1 = vld [vmem:[#allocation10 + $0x8] sm:$0xff]   ;;  %v1598_v2 = vld [vmem:[#allocation10] sm:$0xff]   ;;  %v1599_v4 = vld [vmem:[#allocation9 + $0x8] sm:$0xff]   ;;  %vm496_vm1 = vcmask 261120   ;;  %v620_v38 = vlaneseq }
  0x74   : > { %1824 = vsyncadd (%p2283_p12), [#allocation11], 4294966784  ;;  %1413 = vmatprep.subr.bf16.mxu0 %v1860_v0  ;;  %1417 = vmatprep.mubr.msk.bf16.mxu0 %vm1861_vm0, %v1860_v0  ;;  %v2102_v3 = vld [vmem:[%s405_s13] sm:$0xff]  ;;  %v1600_v5 = vld [vmem:[#allocation9] sm:$0xff]   ;;  %vm541_vm2 = vcmask 519168   ;;  %vm625_vm3 = vcmask 64512  }
  0x75   : > { %1421 = vmatprep.subr.bf16.mxu1 %v1860_v0  ;;  %1425 = vmatprep.mubr.msk.bf16.mxu1 %vm1861_vm0, %v1860_v0  ;;  %v472_v6 = vpack.c.bf16 %v2102_v3, %v2102_v3  ;;  %v1358_v7 = vld [vmem:[%s2244_s5] ss:$0 sm:$0xff]  ;;  %s1862_s11 = smov 112   ;;  %s1863_s27 = smov 120   ;;  %vm691_vm4 = vcmask 1043456   ;;  %v621_v41 = vshrl.u32 %v620_v38, 7 }
  0x76   : > { %1414 = vmatpush3.bf16.msra.mxu0 %v1597_v1  ;;  %1422 = vmatpush3.bf16.msra.mxu1 %v1599_v4  ;;  %v1362_v16 = vld [vmem:[%s2242_s3] ss:$0 sm:$0xff]  ;;  %s1864_s30 = smov 104   ;;  %s1865_s25 = smov 96   ;;  %vm856_vm5 = vcmask 130112   ;;  %vm976_vm6 = vcmask 195712  }
  0x77   : > { %1415 = vmatprep.subr.bf16.mxu0 %v1860_v0  ;;  %1423 = vmatprep.subr.bf16.mxu1 %v1860_v0  ;;  %v614_v39 = vld [vmem:[%s413_s18] sm:$0x1]  ;;  %v622_v43 = vsub.s32 0, %v621_v41  ;;  %s1866_s24 = smov 80   ;;  %s1867_s12 = smov 72   ;;  %vm1096_vm7 = vcmask 261312  }
  0x78   : > { %v615_v40 = vsub.f32 1.0, %v614_v39  ;;  %s1868_s2 = smov 88   ;;  %s1869_s22 = smov 8  }
  0x79   : > { %s1870_s20 = smov 16   ;;  %s1871_s28 = smov 24  }
  0x7a   : > { %1416 = vmatpush3.bf16.msra.mxu0 %v1598_v2  ;;  %1424 = vmatpush3.bf16.msra.mxu1 %v1600_v5  ;;  %v616_v42 = vmul.f32 -10000.0, %v615_v40  ;;  %s1385_s23 = sshll.u32 %s1843_s16, 7  ;;  %s465_s29 = scalar_lea.vmem [#allocation13], %s1353_s15 }
  0x7b   : > { %1429 = vmatprep.subr.bf16.mxu0 %v1860_v0  ;;  %1435 = vmatprep.subr.bf16.mxu1 %v1860_v0 }
  0x7c   : > { %v623_v44 = vrot.slane %v616_v42, %v622_v43 }
  0x7d   : > { %1418 = vmatmul.mubr.msk.bf16.vlgmr.msra.gmra.mxu0 %vm496_vm1, %v472_v6  ;;  %1426 = vmatmul.mubr.msk.bf16.vlgmr.msra.gmra.mxu1 %vm496_vm1, %v472_v6 }
  0x7e   : > { %1431 = vmatprep.mubr.msk.bf16.mxu0 %vm1861_vm0, %v1860_v0  ;;  %1437 = vmatprep.mubr.msk.bf16.mxu1 %vm1861_vm0, %v1860_v0 }
 0x13d   : > { %v534_v8 = vpop.f32.mrf.mxu0  ;;  %v608_v12 = vpop.f32.mrf.mxu1 }
 0x13e   : > { %v535_v9 = vadd.f32 %v1358_v7, %v534_v8  ;;  %v609_v19 = vadd.f32 %v1362_v16, %v608_v12 }
 0x13f   : > { %v1419_v10 = vpop.f32.mrf.mxu0  ;;  %v1427_v14 = vpop.f32.mrf.mxu1 }
 0x140   : > { %v540_v11 = vpack.c.bf16 %v535_v9, %v535_v9  ;;  %v617_v24 = vpack.c.bf16 %v609_v19, %v609_v19 }
 0x141   : > { %v537_v13 = vpop.f32.mrf.mxu0  ;;  %v611_v17 = vpop.f32.mrf.mxu1 }
 0x142   : > { %542 = vst.msk [vmem:[#allocation2] sm:$0xf] %vm541_vm2, %v540_v11 }
 0x143   : > { %v1420_v15 = vpop.f32.mrf.mxu0  ;;  %v1428_v18 = vpop.f32.mrf.mxu1 }
 0x149   : > { %v618_v20 = vld [vmem:[#allocation2] sm:$0xf] }
 0x14a   : > { %v2122_v21 = vld [vmem:[#allocation2] ss:$0 sps:$4 sm:$0xff]   ;;  %v630_v22 = vsel %vm625_vm3, %v618_v20, 0  ;;  %v1367_v26 = vcombine.low %v618_v20, %v618_v20 }
 0x14b   : > { %v2125_v23 = vld [vmem:[#allocation2] ss:$0 sps:$4 sm:$0xff]   ;;  %1430 = vmatpush3.bf16.xpose.msra.mxu0 %v630_v22  ;;  %864 = vrot.lane.b32.xlu1 %v2122_v21, %s1862_s11 }
 0x14c   : > { %744 = vrot.lane.b32.xlu0 %v2125_v23, %s1863_s27  ;;  %1441 = vmatprep.subr.bf16.mxu0 %v1860_v0  ;;  %v2131_v25 = vld [vmem:[#allocation2] ss:$0 sps:$4 sm:$0xff]  }
 0x14f   : > { %859 = vrot.lane.b32.xlu1 %v617_v24, %s1862_s11  ;;  %s1213_s11 = sshll.u32 %s465_s29, 4  ;;  %s1214_s11 = int_to_ptr.vmem [resolvable:$true] %s1213_s11 }
 0x150   : > { %739 = vrot.lane.b32.xlu0 %v617_v24, %s1863_s27 }
 0x152   : > { %1432 = vmatmul.mubr.msk.bf16.vlgmr.msra.gmra.mxu0 %vm625_vm3, %v617_v24 }
 0x153   : > { %979 = vrot.lane.b32.xlu1 %v617_v24, %s1864_s30  ;;  %1443 = vmatprep.mubr.msk.bf16.mxu0 %vm1861_vm0, %v1860_v0 }
 0x154   : > { %984 = vrot.lane.b32.xlu0 %v2131_v25, %s1864_s30 }
 0x157   : > { %686 = vrot.lane.b32.xlu1 %v1367_v26, %s1865_s25  ;;  %s1211_s25 = scalar_lea.hbm %s2249_s10, %s1385_s23 }
 0x1bd   : > { %v865_v27 = vpop.permute.xlu1 %864 }
 0x1be   : > { %v745_v28 = vpop.permute.xlu0 %744  ;;  %v870_v33 = vsel %vm625_vm3, %v865_v27, 0 }
 0x1bf   : > { %v750_v29 = vsel %vm625_vm3, %v745_v28, 0 }
 0x1c0   : > { %1442 = vmatpush3.bf16.xpose.msra.mxu0 %v750_v29 }
 0x1c1   : > { %v860_v30 = vpop.permute.xlu1 %859  ;;  %1453 = vmatprep.subr.bf16.mxu0 %v1860_v0 }
 0x1c2   : > { %v740_v32 = vpop.permute.xlu0 %739 }
 0x1c5   : > { %v980_v31 = vpop.permute.xlu1 %979 }
 0x1c6   : > { %v985_v36 = vpop.permute.xlu0 %984 }
 0x1c7   : > { %1444 = vmatmul.mubr.msk.bf16.vlgmr.msra.gmra.mxu0 %vm625_vm3, %v740_v32  ;;  %v990_v37 = vsel %vm625_vm3, %v985_v36, 0 }
 0x1c8   : > { %1454 = vmatpush3.bf16.xpose.msra.mxu0 %v870_v33  ;;  %1455 = vmatprep.mubr.msk.bf16.mxu0 %vm1861_vm0, %v1860_v0 }
 0x1c9   : > { %v687_v34 = vpop.permute.xlu1 %686  ;;  %1465 = vmatprep.subr.bf16.mxu0 %v1860_v0 }
 0x1ca   : > { %v693_v35 = vsel %vm691_vm4, %v687_v34, 0 }
 0x1cb   : > { %1436 = vmatpush3.bf16.msra.mxu1 %v693_v35 }
 0x1cc   : > { %1447 = vmatprep.subr.bf16.mxu1 %v1860_v0 }
 0x1cf   : > { %1456 = vmatmul.mubr.msk.bf16.vlgmr.msra.gmra.mxu0 %vm625_vm3, %v860_v30 }
 0x1d0   : > { %1466 = vmatpush3.bf16.xpose.msra.mxu0 %v990_v37  ;;  %1467 = vmatprep.mubr.msk.bf16.mxu0 %vm1861_vm0, %v1860_v0 }
 0x1d1   : > { %1477 = vmatprep.subr.bf16.mxu0 %v1860_v0 }
 0x1d7   : > { %1468 = vmatmul.mubr.msk.bf16.vlgmr.msra.gmra.mxu0 %vm625_vm3, %v980_v31 }
 0x1d8   : > { %1481 = vmatprep.mubr.msk.bf16.mxu0 %vm1861_vm0, %v1860_v0 }
 0x212   : > { %v666_v45 = vpop.f32.mrf.mxu0 }
 0x213   : > { %v667_v46 = vadd.f32 %v666_v45, %v623_v44 }
 0x214   : > { %v1433_v47 = vpop.f32.mrf.mxu0 }
 0x215   : > { %v672_v48 = vsel %vm625_vm3, %v667_v46, -inf }
 0x216   : > { %673 = vmax.xlane.f32.xlu0 %v672_v48  ;;  %v669_v49 = vpop.f32.mrf.mxu0 }
 0x218   : > { %v1434_v50 = vpop.f32.mrf.mxu0 }
 0x287   : > { %v786_v51 = vpop.f32.mrf.mxu0 }
 0x288   : > { %v787_v52 = vadd.f32 %v786_v51, %v623_v44 }
 0x289   : > { %v1445_v53 = vpop.f32.mrf.mxu0 }
 0x28a   : > { %v792_v54 = vsel %vm625_vm3, %v787_v52, -inf  ;;  %v1605_v53 = vld [vmem:[#allocation12 + $0x8] sm:$0xff]  }
 0x28b   : > { %793 = vmax.xlane.f32.xlu1 %v792_v54  ;;  %v789_v55 = vpop.f32.mrf.mxu0  ;;  %1478 = vmatpush3.bf16.msra.mxu0 %v1605_v53 }
 0x28c   : > { %1479 = vmatprep.subr.bf16.mxu0 %v1860_v0 }
 0x28d   : > { %v1446_v56 = vpop.f32.mrf.mxu0 }
 0x28e   : > { %v1606_v56 = vld [vmem:[#allocation12] sm:$0xff]  }
 0x28f   : > { %v906_v57 = vpop.f32.mrf.mxu0  ;;  %1480 = vmatpush3.bf16.msra.mxu0 %v1606_v56 }
 0x290   : > { %v907_v58 = vadd.f32 %v906_v57, %v623_v44 }
 0x291   : > { %v1457_v59 = vpop.f32.mrf.mxu0 }
 0x292   : > { %v912_v60 = vsel %vm625_vm3, %v907_v58, -inf }
 0x293   : > { %913 = vmax.xlane.f32.xlu0 %v912_v60  ;;  %v909_v61 = vpop.f32.mrf.mxu0 }
 0x295   : > { %v1458_v62 = vpop.f32.mrf.mxu0 }
 0x297   : > { %v1026_v63 = vpop.f32.mrf.mxu0 }
 0x298   : > { %v1027_v1 = vadd.f32 %v1026_v63, %v623_v44 }
 0x299   : > { %v1469_v2 = vpop.f32.mrf.mxu0 }
 0x29a   : > { %v1032_v4 = vsel %vm625_vm3, %v1027_v1, -inf }
 0x29b   : > { %1033 = vmax.xlane.f32.xlu0 %v1032_v4  ;;  %v1029_v5 = vpop.f32.mrf.mxu0 }
 0x29c   : > { %923 = vrot.lane.b32.xlu1 %v2122_v21, %s1866_s24  ;;  %s1199_s24 = scalar_lea.sflag [#allocation6], %s2072_s4 }
 0x29d   : > { %v1470_v6 = vpop.f32.mrf.mxu0 }
 0x29f   : > { %v674_v7 = vpop.xlane.xlu0 %673 }
 0x2a0   : > { %v675_v8 = vsub.f32 %v667_v46, %v674_v7  ;;  %1043 = vrot.lane.b32.xlu1 %v2131_v25, %s1867_s12  ;;  %s1759_s12 = scalar_lea.vmem %s1214_s11, 128 }
 0x2a1   : > { %p1760_p0 = scmp.ne.s32.totalorder %s1214_s11, %s1759_s12 }
 0x2a2   : > { %v676_v9 = vmul.f32 1.442695, %v675_v8 }
 0x2a3   : > { %p1761_p3 = pnand %p1760_p0, %p2024_p5 }
 0x2a4   : > { %1607 = vpow2.f32 %v676_v9  ;;  %v1378_v9 = vld [vmem:[%s2246_s7] ss:$0 sm:$0xff] }
 0x2a5   : > { %p1762_p10 = pneg %p1761_p3 }
 0x2b1   : > { %v1608_v10 = vpop.eup %1607  ;;  %803 = vrot.lane.b32.xlu0 %v2125_v23, %s1868_s2  ;;  %s1872_s2 = smov [#allocation13]  }
 0x2b2   : > { %v682_v11 = vpack.c.bf16 %v1608_v10, %v1608_v10  ;;  %v678_v35 = vsel %vm625_vm3, %v1608_v10, 0.0  ;;  %s1763_s16 = sshll.u32 %s1872_s2, 4  ;;  %s1764_s16 = int_to_ptr.vmem [resolvable:$false] %s1763_s16 }
 0x2b3   : > { %s1765_s15 = scalar_lea.vmem %s1764_s16, 256  ;;  %p1766_p11 = scmp.lt.s32.totalorder %s1214_s11, %s1764_s16 }
 0x2b4   : > { %1438 = vmatmul.mubr.msk.bf16.vlgmr.msra.gmra.mxu1 %vm625_vm3, %v682_v11  ;;  %p1767_p9 = scmp.lt.s32.totalorder %s1765_s15, %s1759_s12 }
 0x2b5   : > { %1449 = vmatprep.mubr.msk.bf16.mxu1 %vm1861_vm0, %v1860_v0 }
 0x2b6   : > { %p1768_p13 = por %p1767_p9, %p1766_p11 }
 0x2b8   : > { %p1769_p2 = pnand %p1768_p13, %p1762_p10 }
 0x314   : > { %v794_v12 = vpop.xlane.xlu1 %793 }
 0x315   : > { %v795_v13 = vsub.f32 %v787_v52, %v794_v12 }
 0x317   : > { %v796_v14 = vmul.f32 1.442695, %v795_v13 }
 0x318   : > { %v924_v25 = vpop.permute.xlu1 %923 }
 0x319   : > { %1609 = vpow2.f32 %v796_v14  ;;  %v929_v27 = vsel %vm691_vm4, %v924_v25, 0  ;;  %v1382_v25 = vld [vmem:[%s2247_s8] ss:$0 sm:$0xff] }
 0x31c   : > { %v914_v15 = vpop.xlane.xlu0 %913  ;;  %v1044_v30 = vpop.permute.xlu1 %1043 }
 0x31d   : > { %v915_v16 = vsub.f32 %v907_v58, %v914_v15  ;;  %v1049_v32 = vsel %vm691_vm4, %v1044_v30, 0 }
 0x31f   : > { %v916_v17 = vmul.f32 1.442695, %v915_v16 }
 0x321   : > { %1611 = vpow2.f32 %v916_v17 }
 0x324   : > { %v1034_v18 = vpop.xlane.xlu0 %1033 }
 0x325   : > { %v1035_v19 = vsub.f32 %v1027_v1, %v1034_v18 }
 0x326   : > { %v1610_v20 = vpop.eup %1609 }
 0x327   : > { %v1036_v21 = vmul.f32 1.442695, %v1035_v19  ;;  %v798_v22 = vsel %vm625_vm3, %v1610_v20, 0.0  ;;  %v802_v26 = vpack.c.bf16 %v1610_v20, %v1610_v20 }
 0x328   : > { %799 = vadd.xlane.f32.xlu0 %v798_v22  ;;  %v804_v23 = vpop.permute.xlu0 %803 }
 0x329   : > { %1613 = vpow2.f32 %v1036_v21  ;;  %v809_v24 = vsel %vm691_vm4, %v804_v23, 0 }
 0x32a   : > { %1448 = vmatpush3.bf16.msra.mxu1 %v809_v24 }
 0x32b   : > { %1459 = vmatprep.subr.bf16.mxu1 %v1860_v0 }
 0x32d   : > { %1450 = vmatmul.mubr.msk.bf16.vlgmr.msra.gmra.mxu1 %vm625_vm3, %v802_v26 }
 0x32e   : > { %v1612_v28 = vpop.eup %1611  ;;  %1460 = vmatpush3.bf16.msra.mxu1 %v929_v27  ;;  %1461 = vmatprep.mubr.msk.bf16.mxu1 %vm1861_vm0, %v1860_v0  ;;  %v1383_v27 = vld [vmem:[%s2248_s9] ss:$0 sm:$0xff] }
 0x32f   : > { %v918_v29 = vsel %vm625_vm3, %v1612_v28, 0.0  ;;  %1471 = vmatprep.subr.bf16.mxu1 %v1860_v0  ;;  %v922_v31 = vpack.c.bf16 %v1612_v28, %v1612_v28 }
 0x330   : > { %919 = vadd.xlane.f32.xlu1 %v918_v29 }
 0x335   : > { %1462 = vmatmul.mubr.msk.bf16.vlgmr.msra.gmra.mxu1 %vm625_vm3, %v922_v31 }
 0x336   : > { %v1614_v33 = vpop.eup %1613  ;;  %1472 = vmatpush3.bf16.msra.mxu1 %v1049_v32  ;;  %1473 = vmatprep.mubr.msk.bf16.mxu1 %vm1861_vm0, %v1860_v0 }
 0x337   : > { %v1038_v34 = vsel %vm625_vm3, %v1614_v33, 0.0  ;;  %v1042_v36 = vpack.c.bf16 %v1614_v33, %v1614_v33 }
 0x338   : > { %1039 = vadd.xlane.f32.xlu0 %v1038_v34 }
 0x33c   : > { %679 = vadd.xlane.f32.xlu0 %v678_v35 }
 0x33d   : > { %1474 = vmatmul.mubr.msk.bf16.vlgmr.msra.gmra.mxu1 %vm625_vm3, %v1042_v36 }
 0x374   : > { %v729_v37 = vpop.f32.mrf.mxu1 }
 0x376   : > { %v1439_v38 = vpop.f32.mrf.mxu1 }
 0x378   : > { %v732_v39 = vpop.f32.mrf.mxu1 }
 0x37a   : > { %v1440_v40 = vpop.f32.mrf.mxu1 }
 0x3b1   : > { %v800_v41 = vpop.xlane.xlu0 %799 }
 0x3b9   : > { %v920_v46 = vpop.xlane.xlu1 %919 }
 0x3c1   : > { %v1040_v42 = vpop.xlane.xlu0 %1039 }
 0x3c5   : > { %v680_v43 = vpop.xlane.xlu0 %679 }
 0x3c6   : > { %1615 = vrcp.f32 %v680_v43 }
 0x3c7   : > { %1617 = vrcp.f32 %v800_v41 }
 0x3c8   : > { %1619 = vrcp.f32 %v920_v46 }
 0x3c9   : > { %1621 = vrcp.f32 %v1040_v42 }
 0x3d3   : > { %v1616_v44 = vpop.eup %1615 }
 0x3d4   : > { %v735_v45 = vmul.f32 %v1616_v44, %v729_v37  ;;  %v1618_v47 = vpop.eup %1617 }
 0x3d5   : > { %v1620_v54 = vpop.eup %1619 }
 0x3d6   : > { %736 = vst.msk [vmem:[#allocation3] sm:$0xff] %vm625_vm3, %v735_v45  ;;  %v1622_v61 = vpop.eup %1621 }
 0x3ed   : > { %v845_v48 = vpop.f32.mrf.mxu1 }
 0x3ee   : > { %v851_v49 = vmul.f32 %v1618_v47, %v845_v48 }
 0x3ef   : > { %v1451_v50 = vpop.f32.mrf.mxu1 }
 0x3f0   : > { %853 = vrot.lane.b32.xlu1 %v851_v49, %s1869_s22 }
 0x3f1   : > { %v848_v51 = vpop.f32.mrf.mxu1 }
 0x3f3   : > { %v1452_v52 = vpop.f32.mrf.mxu1 }
 0x3f5   : > { %v965_v55 = vpop.f32.mrf.mxu1 }
 0x3f6   : > { %v971_v57 = vmul.f32 %v1620_v54, %v965_v55 }
 0x3f7   : > { %v1463_v58 = vpop.f32.mrf.mxu1 }
 0x3f8   : > { %973 = vrot.lane.b32.xlu0 %v971_v57, %s1870_s20 }
 0x3f9   : > { %v968_v59 = vpop.f32.mrf.mxu1 }
 0x3fb   : > { %v1464_v60 = vpop.f32.mrf.mxu1 }
 0x3fd   : > { %v1085_v62 = vpop.f32.mrf.mxu1 }
 0x3fe   : > { %v1091_v63 = vmul.f32 %v1622_v61, %v1085_v62 }
 0x3ff   : > { %v1475_v1 = vpop.f32.mrf.mxu1 }
 0x400   : > { %1093 = vrot.lane.b32.xlu1 %v1091_v63, %s1871_s28 }
 0x401   : > { %v1088_v2 = vpop.f32.mrf.mxu1 }
 0x403   : > { %v1476_v4 = vpop.f32.mrf.mxu1 }
 0x462   : > { %v854_v5 = vpop.permute.xlu1 %853 }
 0x463   : > { %857 = vst.msk [vmem:[#allocation3] sm:$0xff] %vm856_vm5, %v854_v5 }
 0x46a   : > { %v974_v6 = vpop.permute.xlu0 %973 }
 0x46b   : > { %977 = vst.msk [vmem:[#allocation3] sm:$0xff] %vm976_vm6, %v974_v6 }
 0x472   : > { %v1094_v0 = vpop.permute.xlu1 %1093 }
 0x473   : > { %1097 = vst.msk [vmem:[#allocation3] sm:$0xff] %vm1096_vm7, %v1094_v0 }
 0x47a   : > { %v1098_v7 = vld [vmem:[#allocation3] sm:$0xff] }
 0x47b   : > { %v1099_v8 = vpack.c.bf16 %v1098_v7, %v1098_v7 }
 0x47d   : > { %1482 = vmatmul.mubr.msk.bf16.vlgmr.msra.gmra.mxu0 %vm496_vm1, %v1099_v8 }
 0x53d   : > { %v1160_v10 = vpop.f32.mrf.mxu0 }
 0x53e   : > { %v1161_v11 = vadd.f32 %v1378_v9, %v1160_v10 }
 0x53f   : > { %v1483_v12 = vpop.f32.mrf.mxu0 }
 0x540   : > { %v1166_v13 = vadd.f32 %v1161_v11, %v2102_v3 }
 0x541   : > { %v1163_v14 = vpop.f32.mrf.mxu0 }
 0x542   : > { %v1167_v15 = vsel %vm496_vm1, %v1166_v13, 0.0 }
 0x543   : > { %1168 = vadd.xlane.f32.xlu1 %v1167_v15  ;;  %v1484_v16 = vpop.f32.mrf.mxu0 }
 0x5cc   : > { %v1169_v17 = vpop.xlane.xlu1 %1168 }
 0x5cd   : > { %v1171_v18 = vmul.f32 0.03125, %v1169_v17 }
 0x5cf   : > { %v1172_v19 = vsub.f32 %v1166_v13, %v1171_v18 }
 0x5d1   : > { %v1173_v20 = vmul.f32 %v1172_v19, %v1172_v19 }
 0x5d3   : > { %v1174_v21 = vsel %vm496_vm1, %v1173_v20, 0.0 }
 0x5d4   : > { %1175 = vadd.xlane.f32.xlu0 %v1174_v21 }
 0x65d   : > { %v1176_v22 = vpop.xlane.xlu0 %1175 }
 0x65e   : > { %v1177_v23 = vmul.f32 0.03125, %v1176_v22 }
 0x660   : > { %v1178_v24 = vadd.f32 1e-12, %v1177_v23 }
 0x662   : > { %1623 = vrsqrt.f32 %v1178_v24 }
 0x66f   : > { %v1624_v3 = vpop.eup %1623 }
 0x670   : > { %v1180_v26 = vmul.f32 %v1624_v3, %v1172_v19 }
 0x672   : > { %v1188_v28 = vmul.f32 %v1382_v25, %v1180_v26 }
 0x674   : > { %v1196_v29 = vadd.f32 %v1383_v27, %v1188_v28 }
 0x676   : > { %1197 = vst.msk [vmem:[%s465_s29] sm:$0xff] %vm496_vm1, %v1196_v29 }
 0x677   : > { %1772 = shalt.err (!%p1769_p2)
}
 0x678   : > { %s1773_s22 = scalar_lea.hbm %s1211_s25, 128  ;;  %s1777_s28 = scalar_lea.hbm %s2249_s10, 256 }
 0x679   : > { %p1774_p4 = scmp.ne.s32.totalorder %s1211_s25, %s1773_s22  ;;  %p1778_p7 = scmp.lt.s32.totalorder %s1211_s25, %s2249_s10 }
 0x67a   : > { %p1779_p6 = scmp.lt.s32.totalorder %s1777_s28, %s1773_s22 }
 0x67b   : > { %p1775_p1 = pnand %p1774_p4, %p2024_p5 }
 0x67c   : > { %p1780_p12 = por %p1779_p6, %p1778_p7 }
 0x67d   : > { %p1776_p8 = pneg %p1775_p1 }
 0x67f   : > { %p1781_p0 = pnand %p1780_p12, %p1776_p8 }
 0x681   : > { %1784 = shalt.err (!%p1781_p0)
}
 0x682   : > { %1501 = dma.vmem_to_hbm [thread:$0]  (%p2024_p5), %s1214_s11, 128, %s1211_s25, %s1199_s24  }
 0x683 PF: > { %s2284_s6 = sld [smem:[#allocation19_spill]] }
 0x684   : > { %s2285_s18 = sld [smem:[#allocation22_spill]] }
 0x685   : > { %s2286_s19 = sld [smem:[#allocation21_spill]] }
 0x689   : > { %s1225_s21 = sand.u32 1, %s2284_s6  }
 0x68a   : > { %p2287_p3 = scmp.ne.s32.totalorder %s2285_s18, 0  ;;  %s1226_s23 = scalar_lea.sflag [#allocation6], %s1225_s21 }
 0x68b   : > { %p2288_p10 = scmp.ge.s32.totalorder %s2286_s19, 2 }
 0x68d   : > { %p1521_p11 = pnand %p2288_p10, %p2287_p3 }
 0x68f   : > { %p1522_p9 = pneg %p1521_p11 }
 0x691   : > { %1826 = dma.done.wait (%p1522_p9), %s1226_s23, 128  }
 0x692   : > { %1828 = vsyncadd (%p1522_p9), %s1226_s23, 4294967168  ;;  %s30_s18 = sadd.s32 1, %s2286_s19   ;;  %s2289_s29 = sld [smem:[#allocation20_spill]] }
 0x693   : > { %p27_p13 = scmp.ge.s32.totalorder %s30_s18, 4   ;;  %s2290_s15 = sld [smem:[#allocation24_spill]] }
 0x694   : > { %s2291_s26 = sld [smem:[#allocation23_spill]]  ;;  %s2292_s13 = smov %s1835_s14 }
 0x695   : > { %s2294_s16 = smov %s1847_s17 }
 0x696   :  { %29 = sbr.rel (!%p27_p13) target bundleno = 14 (0xe), region = 135 }
 0x698   : > { %s2293_s14 = smov %s2289_s29 }
 0x69a   : > { %s2295_s17 = smov %s2291_s26 }
 0x69b   :  { %1231 = vsyncpa [#allocation5], 1 }
 0x69c   :  { %1233 = vsyncpa [#allocation5 + $0x1], 1 }
 0x69d   :  { %1234 = vsyncpa [#allocation8], 1 }
 0x69e   :  { %1236 = vsyncpa [#allocation8 + $0x1], 1 }
 0x69f   :  { %1237 = vsyncpa [#allocation11], 1 }
 0x6a0   :  { %1238 = vsyncpa [#allocation6], 1 }
 0x6a1   :  { %1240 = vsyncpa [#allocation6 + $0x1], 1 }

</bundles_post_ra>
